<compile_context>
chip_gen: v6e
topology: v6e:2x2x1
jax: 0.10.0
libtpu: 0.0.40
codegen_flags: <defaults>
</compile_context>

<pallas_src>
from math import sqrt

import jax
import jax.numpy as jnp
from jax.experimental import pallas as pl
from jax.experimental.pallas import tpu as pltpu

# Contract last dim of lhs with last dim of rhs (A @ B^T) -- MXU-native "NT" form.
_NT_DIMS = (((1,), (1,)), ((), ()))


def _round_up(n, m):
    return ((n + m - 1) // m) * m


def _choose_tile(batch, batch_tile):
    """Lane-aligned batch tile, as large as the cap allows, balanced across tiles."""
    cap = _round_up(max(int(batch_tile), 128), 128)
    n_hint = pl.cdiv(batch, cap)
    tile = min(_round_up(pl.cdiv(batch, n_hint), 128), cap)
    return tile, pl.cdiv(batch, tile)


def _mlp_kernel(x_ref, w1_ref, b1_ref, w2_ref, b2_ref, w3_ref, b3_ref, o_ref):
    cd = w1_ref.dtype                      # MXU operand dtype (f32 or bf16)
    x = x_ref[...].astype(cd)              # (T, d_in); cast (if any) hidden under DMA

    # Layer 1 (NT): (d_h1, d_in) x (T, d_in)^T -> (d_h1, T), f32 accumulate.
    h1 = jax.lax.dot_general(w1_ref[...], x, _NT_DIMS,
                             preferred_element_type=jnp.float32)
    h1 = jnp.maximum(h1 + b1_ref[...], 0.0)            # bias (d_h1, 1), ReLU in f32

    # Layer 2: (d_h2, d_h1) @ (d_h1, T) -> (d_h2, T).
    h2 = jnp.dot(w2_ref[...], h1.astype(cd), preferred_element_type=jnp.float32)
    h2 = jnp.maximum(h2 + b2_ref[...], 0.0)

    # Layer 3 (regression head): (d_out, d_h2) @ (d_h2, T) -> (d_out, T).
    y = jnp.dot(w3_ref[...], h2.astype(cd), preferred_element_type=jnp.float32)
    o_ref[...] = (y + b3_ref[...]).astype(o_ref.dtype)  # lane-dense (d_out, T) store


def mlp_forward(x, params, *, batch_tile=16384, compute_dtype=jnp.float32,
                transposed_output=False):
    """3-layer MLP forward pass (Linear-ReLU-Linear-ReLU-Linear) with one Pallas kernel.

    x:      (B, d_in) float32
    params: torch-layout ((W1, b1), (W2, b2), (W3, b3)); Wi of shape (out_i, in_i),
            bi of shape (out_i,)  (exactly what nn.Linear stores).
    Returns (B, d_out), or (d_out, B) if transposed_output=True (avoids a wrapper
    transpose / extra HBM pass when d_out > 1).
    """
    (W1, b1), (W2, b2), (W3, b3) = params
    B, d_in = x.shape
    d_h1, d_h2, d_out = W1.shape[0], W2.shape[0], W3.shape[0]
    cd = jnp.dtype(compute_dtype)

    # Tiny resident params: weights stay in torch (out, in) layout, biases become
    # (out, 1) columns (broadcast over the lane/batch axis).  Biases stay f32.
    w1 = W1.astype(cd)
    w2 = W2.astype(cd)
    w3 = W3.astype(cd)
    b1c = b1.reshape(d_h1, 1).astype(jnp.float32)
    b2c = b2.reshape(d_h2, 1).astype(jnp.float32)
    b3c = b3.reshape(d_out, 1).astype(jnp.float32)

    tile, n_tiles = _choose_tile(B, batch_tile)

    def resident(a):  # constant index map -> stays in VMEM across all grid steps
        return pl.BlockSpec(a.shape, lambda i: (0,) * a.ndim)

    flops = 2 * B * (d_in * d_h1 + d_h1 * d_h2 + d_h2 * d_out)
    bytes_accessed = int(
        x.size * x.dtype.itemsize
        + sum(int(a.size) * a.dtype.itemsize for a in (w1, w2, w3, b1c, b2c, b3c))
        + B * d_out * jnp.dtype(x.dtype).itemsize)

    out_t = pl.pallas_call(
        _mlp_kernel,
        out_shape=jax.ShapeDtypeStruct((d_out, B), x.dtype),
        grid_spec=pltpu.PrefetchScalarGridSpec(
            num_scalar_prefetch=0,
            grid=(n_tiles,),
            in_specs=[
                pl.BlockSpec((tile, d_in), lambda i: (i, 0)),   # streamed x tile (f32)
                resident(w1), resident(b1c),
                resident(w2), resident(b2c),
                resident(w3), resident(b3c),
            ],
            out_specs=pl.BlockSpec((d_out, tile), lambda i: (0, i)),  # lane-dense out
        ),
        compiler_params=pltpu.CompilerParams(
            dimension_semantics=("parallel",),       # batch axis -> megacore shardable
        ),
        cost_estimate=pl.CostEstimate(
            flops=flops, transcendentals=0, bytes_accessed=bytes_accessed),
    )(x, w1, b1c, w2, b2c, w3, b3c)

    if transposed_output:
        return out_t              # (d_out, B)
    return out_t.T                # (B, d_out); free reshape when d_out == 1


def init_mlp_params(key, archit):
    """Mirror MLP_Module.reset_parameters: W ~ U(-sqrt(3/fan_in), +sqrt(3/fan_in)), b = 0.

    Returns torch-layout params: Wi of shape (out_i, in_i), bi of shape (out_i,)."""
    params = []
    for i in range(len(archit) - 1):
        fan_in, fan_out = archit[i], archit[i + 1]
        key, sub = jax.random.split(key)
        h = sqrt(3.0 / fan_in)
        w = jax.random.uniform(sub, (fan_out, fan_in), jnp.float32, -h, +h)
        b = jnp.zeros((fan_out,), jnp.float32)
        params.append((w, b))
    return tuple(params)


def mlp_reference(x, params, compute_dtype=jnp.float32):
    """Pure-JAX reference of the same forward pass (same dtype policy as the kernel)."""
    (W1, b1), (W2, b2), (W3, b3) = params
    cd = compute_dtype
    h1 = jnp.dot(x.astype(cd), W1.T.astype(cd), preferred_element_type=jnp.float32) + b1
    h1 = jnp.maximum(h1, 0.0)
    h2 = jnp.dot(h1.astype(cd), W2.T.astype(cd), preferred_element_type=jnp.float32) + b2
    h2 = jnp.maximum(h2, 0.0)
    y = jnp.dot(h2.astype(cd), W3.T.astype(cd), preferred_element_type=jnp.float32) + b3
    return y


if __name__ == "__main__":
    # hyp = {'task': 'regression', 'archit': (5, 20, 20, 1), 'f_hid': nn.ReLU()}
    archit = (5, 20, 20, 1)

    key = jax.random.PRNGKey(0)
    key, pkey = jax.random.split(key)
    params = init_mlp_params(pkey, archit)

    cases = []
    key, k1 = jax.random.split(key)
    cases.append((jax.random.normal(k1, (8, archit[0]), jnp.float32), 16384))    # tiny batch, 1 tile
    key, k2 = jax.random.split(key)
    cases.append((jax.random.normal(k2, (300, archit[0]), jnp.float32), 16384))  # ragged, 1 partial tile
    key, k3 = jax.random.split(key)
    cases.append((jax.random.normal(k3, (1000, archit[0]), jnp.float32), 256))   # multi-tile grid + partial tail

    for x, bt in cases:
        # Exact f32 semantics (default).
        out = jax.block_until_ready(mlp_forward(x, params, batch_tile=bt))
        ref = mlp_reference(x, params)
        assert out.shape == (x.shape[0], archit[-1]), out.shape
        assert jnp.allclose(out, ref, atol=1e-5, rtol=1e-5), \
            float(jnp.max(jnp.abs(out - ref)))

        # Optional bf16 MXU operands (weights pre-cast, x cast in-kernel), f32 epilogue.
        out_bf = jax.block_until_ready(
            mlp_forward(x, params, batch_tile=bt, compute_dtype=jnp.bfloat16))
        ref_bf = mlp_reference(x, params, compute_dtype=jnp.bfloat16)
        assert out_bf.shape == (x.shape[0], archit[-1]), out_bf.shape
        assert jnp.allclose(out_bf, ref_bf, atol=1e-2, rtol=1e-2), \
            float(jnp.max(jnp.abs(out_bf - ref_bf)))

    print("KERNEL_OK")
</pallas_src>

<mosaic_0001>
module attributes {stable_mosaic.version = 11 : i64} {
  func.func @_mlp_kernel(%arg0: i32, %arg1: memref<128x5xf32, #tpu.memory_space<vmem>>, %arg2: memref<20x5xf32, #tpu.memory_space<vmem>>, %arg3: memref<20x1xf32, #tpu.memory_space<vmem>>, %arg4: memref<20x20xf32, #tpu.memory_space<vmem>>, %arg5: memref<20x1xf32, #tpu.memory_space<vmem>>, %arg6: memref<1x20xf32, #tpu.memory_space<vmem>>, %arg7: memref<1x1xf32, #tpu.memory_space<vmem>>, %arg8: memref<1x128xf32, #tpu.memory_space<vmem>>) attributes {dimension_semantics = [#tpu.dimension_semantics<parallel>], iteration_bounds = array<i64: 1>, scalar_prefetch = 0 : i64, scratch_operands = 0 : i64, tpu.core_type = #tpu.core_type<tc>, window_params = [{transform_indices = @transform_0, window_bounds = array<i64: 128, 5>}, {pipeline_mode = #tpu.pipeline_mode<synchronous>, transform_indices = @transform_1, window_bounds = array<i64: 20, 5>}, {pipeline_mode = #tpu.pipeline_mode<synchronous>, transform_indices = @transform_2, window_bounds = array<i64: 20, 1>}, {pipeline_mode = #tpu.pipeline_mode<synchronous>, transform_indices = @transform_3, window_bounds = array<i64: 20, 20>}, {pipeline_mode = #tpu.pipeline_mode<synchronous>, transform_indices = @transform_4, window_bounds = array<i64: 20, 1>}, {pipeline_mode = #tpu.pipeline_mode<synchronous>, transform_indices = @transform_5, window_bounds = array<i64: 1, 20>}, {pipeline_mode = #tpu.pipeline_mode<synchronous>, transform_indices = @transform_6, window_bounds = array<i64: 1, 1>}, {transform_indices = @transform_7, window_bounds = array<i64: 1, 128>}]} {
    %c0 = arith.constant 0 : index
    %c0_0 = arith.constant 0 : index
    %0 = vector.load %arg1[%c0, %c0_0] : memref<128x5xf32, #tpu.memory_space<vmem>>, vector<128x5xf32>
    %c0_1 = arith.constant 0 : index
    %c0_2 = arith.constant 0 : index
    %1 = vector.load %arg2[%c0_1, %c0_2] : memref<20x5xf32, #tpu.memory_space<vmem>>, vector<20x5xf32>
    %cst = arith.constant dense<0.000000e+00> : vector<20x128xf32>
    %2 = tpu.matmul %1, %0, %cst {dimension_numbers = #tpu.dot_dimension_numbers<[1], [1], [0], [0], [0, 0, 1, 0], [], []>} : vector<20x5xf32>, vector<128x5xf32>, vector<20x128xf32> -> vector<20x128xf32>
    %c0_3 = arith.constant 0 : index
    %c0_4 = arith.constant 0 : index
    %3 = vector.load %arg3[%c0_3, %c0_4] : memref<20x1xf32, #tpu.memory_space<vmem>>, vector<20x1xf32>
    %4 = vector.broadcast %3 : vector<20x1xf32> to vector<20x128xf32>
    %5 = arith.addf %2, %4 : vector<20x128xf32>
    %cst_5 = arith.constant 0.000000e+00 : f32
    %6 = vector.broadcast %cst_5 : f32 to vector<20x128xf32>
    %7 = arith.maximumf %5, %6 : vector<20x128xf32>
    %c0_6 = arith.constant 0 : index
    %c0_7 = arith.constant 0 : index
    %8 = vector.load %arg4[%c0_6, %c0_7] : memref<20x20xf32, #tpu.memory_space<vmem>>, vector<20x20xf32>
    %cst_8 = arith.constant dense<0.000000e+00> : vector<20x128xf32>
    %9 = tpu.matmul %8, %7, %cst_8 {dimension_numbers = #tpu.dot_dimension_numbers<[1], [0], [0], [1], [0, 0, 1, 1], [], []>} : vector<20x20xf32>, vector<20x128xf32>, vector<20x128xf32> -> vector<20x128xf32>
    %c0_9 = arith.constant 0 : index
    %c0_10 = arith.constant 0 : index
    %10 = vector.load %arg5[%c0_9, %c0_10] : memref<20x1xf32, #tpu.memory_space<vmem>>, vector<20x1xf32>
    %11 = vector.broadcast %10 : vector<20x1xf32> to vector<20x128xf32>
    %12 = arith.addf %9, %11 : vector<20x128xf32>
    %cst_11 = arith.constant 0.000000e+00 : f32
    %13 = vector.broadcast %cst_11 : f32 to vector<20x128xf32>
    %14 = arith.maximumf %12, %13 : vector<20x128xf32>
    %c0_12 = arith.constant 0 : index
    %c0_13 = arith.constant 0 : index
    %15 = vector.load %arg6[%c0_12, %c0_13] : memref<1x20xf32, #tpu.memory_space<vmem>>, vector<1x20xf32>
    %cst_14 = arith.constant dense<0.000000e+00> : vector<1x128xf32>
    %16 = tpu.matmul %15, %14, %cst_14 {dimension_numbers = #tpu.dot_dimension_numbers<[1], [0], [0], [1], [0, 0, 1, 1], [], []>} : vector<1x20xf32>, vector<20x128xf32>, vector<1x128xf32> -> vector<1x128xf32>
    %c0_15 = arith.constant 0 : index
    %c0_16 = arith.constant 0 : index
    %17 = vector.load %arg7[%c0_15, %c0_16] : memref<1x1xf32, #tpu.memory_space<vmem>>, vector<1x1xf32>
    %18 = vector.broadcast %17 : vector<1x1xf32> to vector<1x128xf32>
    %19 = arith.addf %16, %18 : vector<1x128xf32>
    %c0_17 = arith.constant 0 : index
    %c0_18 = arith.constant 0 : index
    %20 = vector.load %arg8[%c0_17, %c0_18] : memref<1x128xf32, #tpu.memory_space<vmem>>, vector<1x128xf32>
    tpu.vector_store %arg8[%c0_17, %c0_18], %19 {strides = array<i32>} : memref<1x128xf32, #tpu.memory_space<vmem>>, vector<1x128xf32>,
    return
  }
  func.func @transform_0(%arg0: i32) -> (i32, i32) {
    %c0_i32 = arith.constant 0 : i32
    %c0_i32_0 = arith.constant 0 : i32
    return %arg0, %c0_i32 : i32, i32
  }
  func.func @transform_1(%arg0: i32) -> (i32, i32) {
    %c0_i32 = arith.constant 0 : i32
    %c0_i32_0 = arith.constant 0 : i32
    %c0_i32_1 = arith.constant 0 : i32
    return %c0_i32, %c0_i32_0 : i32, i32
  }
  func.func @transform_2(%arg0: i32) -> (i32, i32) {
    %c0_i32 = arith.constant 0 : i32
    %c0_i32_0 = arith.constant 0 : i32
    %c0_i32_1 = arith.constant 0 : i32
    return %c0_i32, %c0_i32_0 : i32, i32
  }
  func.func @transform_3(%arg0: i32) -> (i32, i32) {
    %c0_i32 = arith.constant 0 : i32
    %c0_i32_0 = arith.constant 0 : i32
    %c0_i32_1 = arith.constant 0 : i32
    return %c0_i32, %c0_i32_0 : i32, i32
  }
  func.func @transform_4(%arg0: i32) -> (i32, i32) {
    %c0_i32 = arith.constant 0 : i32
    %c0_i32_0 = arith.constant 0 : i32
    %c0_i32_1 = arith.constant 0 : i32
    return %c0_i32, %c0_i32_0 : i32, i32
  }
  func.func @transform_5(%arg0: i32) -> (i32, i32) {
    %c0_i32 = arith.constant 0 : i32
    %c0_i32_0 = arith.constant 0 : i32
    %c0_i32_1 = arith.constant 0 : i32
    return %c0_i32, %c0_i32_0 : i32, i32
  }
  func.func @transform_6(%arg0: i32) -> (i32, i32) {
    %c0_i32 = arith.constant 0 : i32
    %c0_i32_0 = arith.constant 0 : i32
    %c0_i32_1 = arith.constant 0 : i32
    return %c0_i32, %c0_i32_0 : i32, i32
  }
  func.func @transform_7(%arg0: i32) -> (i32, i32) {
    %c0_i32 = arith.constant 0 : i32
    %c0_i32_0 = arith.constant 0 : i32
    return %c0_i32, %arg0 : i32, i32
  }
}

</mosaic_0001>

<bundles_post_ra>
// kernel: tpu_custom_call.1
= control target key start
LH: loop header
LB: loop body
LE: loop exit
PB: predicated region body
PF: predicated region fallthrough
CT: control target
= control target key end

     0   :  { %s772_s0 = inlined_call_operand.vmem [shape: f32[8,5], index: 0, kind: input, shape index: {}]   ;;  %s773_s1 = inlined_call_operand.vmem [shape: f32[20,5], index: 1, kind: input, shape index: {}]   ;;  %s774_s2 = inlined_call_operand.vmem [shape: f32[20,1], index: 2, kind: input, shape index: {}]   ;;  %s775_s3 = inlined_call_operand.vmem [shape: f32[20,20], index: 3, kind: input, shape index: {}]   ;;  %s776_s4 = inlined_call_operand.vmem [shape: f32[20,1], index: 4, kind: input, shape index: {}]   ;;  %s777_s5 = inlined_call_operand.vmem [shape: f32[1,20], index: 5, kind: input, shape index: {}]   ;;  %s778_s6 = inlined_call_operand.<no memory space> [shape: f32[1,1], index: 6, kind: input, shape index: {}]   ;;  %s779_s7 = inlined_call_operand.hbm [shape: f32[1,8], index: 7, kind: output, shape index: {}]  }
   0x1   :  { %v12_v0 = vstv %s778_s6 }
   0x2   :  { %13 = vst [vmem:[#allocation2] sm:$0x1] %v12_v0 }
   0x3   :  { %v44_v1 = vld [vmem:[%s772_s0 + $0x78] sm:$0xff]  ;;  %vm66_vm0 = vcmask 39936   ;;  %v574_v2 = vmov 0.0   ;;  %vm575_vm1 = vmmov 0   ;;  %v576_v3 = vmov 0   ;;  %v43_v4 = vld [vmem:[%s772_s0 + $0x70] sm:$0xff] }
   0x4   :  { %481 = vmatprep.subr.mxu0 %v574_v2  ;;  %513 = vmatprep.mubr.msk.f32.mxu0 %vm575_vm1, %v574_v2  ;;  %v50_v5 = vld [vmem:[%s774_s2 + $0x10] sm:$0xf]  ;;  %v42_v6 = vld [vmem:[%s772_s0 + $0x68] sm:$0xff]  ;;  %v48_v7 = vld [vmem:[%s774_s2] sm:$0xff] }
   0x5   :  { %482 = vmatpush3.xpose.msk.msra.mxu0 %vm66_vm0, %v44_v1  ;;  %550 = vset.pattern.permute.xlu0 %v576_v3  ;;  %v49_v8 = vld [vmem:[%s774_s2 + $0x8] sm:$0xff] }
   0x6   :  { %483 = vmatprep.subr.mxu0 %v574_v2  ;;  %551 = vset.pattern.permute.xlu1 %v576_v3 }
   0x7   :  { %522 = vmatprep.subr.mxu1 %v574_v2  ;;  %528 = vmatprep.mubr.msk.f32.mxu1 %vm575_vm1, %v574_v2 }
   0x8   :  { %63 = vperm.xlu0 %550, %v50_v5   ;;  %53 = vperm.xlu1 %551, %v48_v7  }
   0x9   :  { %484 = vmatpush3.xpose.msk.msra.mxu0 %vm66_vm0, %v43_v4 }
   0xa   :  { %485 = vmatprep.subr.mxu0 %v574_v2 }
   0xb   :  { %14 = vsyncpa [#allocation4], 0  ;;  %v212_v9 = vld [vmem:[%s776_s4 + $0x10] sm:$0xf]  ;;  %v41_v10 = vld [vmem:[%s772_s0 + $0x60] sm:$0xff]  ;;  %vm238_vm2 = vcmask 1043456   ;;  %v332_v63 = vlaneseq }
   0xc   :  { %58 = vperm.xlu0 %550, %v49_v8   ;;  %v211_v11 = vld [vmem:[%s776_s4 + $0x8] sm:$0xff]  ;;  %225 = vperm.xlu1 %551, %v212_v9   ;;  %v210_v12 = vld [vmem:[%s776_s4] sm:$0xff]  ;;  %v40_v13 = vld [vmem:[%s772_s0 + $0x58] sm:$0xff]  ;;  %vm228_vm3 = vcmask 162816   ;;  %s577_s28 = smov [#allocation3]  }
   0xd   :  { %486 = vmatpush3.xpose.msk.msra.mxu0 %vm66_vm0, %v42_v6  ;;  %v326_v14 = vld [vmem:[#allocation2] sm:$0x1]  ;;  %v39_v15 = vld [vmem:[%s772_s0 + $0x50] sm:$0xff]  ;;  %v38_v16 = vld [vmem:[%s772_s0 + $0x48] sm:$0xff]  ;;  %v333_v0 = vshrl.u32 %v332_v63, 7  ;;  %s419_s29 = sshll.u32 %s577_s28, 4  ;;  %s420_s29 = int_to_ptr.vmem [resolvable:$true] %s419_s29 }
   0xe   :  { %487 = vmatprep.subr.mxu0 %v574_v2  ;;  %v37_v17 = vld [vmem:[%s772_s0 + $0x40] sm:$0xff]  ;;  %v36_v18 = vld [vmem:[%s772_s0 + $0x38] sm:$0xff]  ;;  %v35_v19 = vld [vmem:[%s772_s0 + $0x30] sm:$0xff]  ;;  %s552_s30 = scalar_lea.vmem %s420_s29, 16  ;;  %p557_p1 = scmp.lt.s32.totalorder %s420_s29, %s420_s29 }
   0xf   :  { %v34_v20 = vld [vmem:[%s772_s0 + $0x28] sm:$0xff]  ;;  %v33_v21 = vld [vmem:[%s772_s0 + $0x20] sm:$0xff]  ;;  %v32_v22 = vld [vmem:[%s772_s0 + $0x18] sm:$0xff]  ;;  %v334_v1 = vsub.s32 0, %v333_v0  ;;  %p553_p0 = scmp.ne.s32.totalorder %s420_s29, %s552_s30 }
  0x10   :  { %220 = vperm.xlu0 %550, %v211_v11   ;;  %215 = vperm.xlu1 %551, %v210_v12   ;;  %v31_v23 = vld [vmem:[%s772_s0 + $0x10] sm:$0xff]  ;;  %v30_v24 = vld [vmem:[%s772_s0 + $0x8] sm:$0xff]  ;;  %v29_v25 = vld [vmem:[%s772_s0] sm:$0xff] }
  0x11   :  { %488 = vmatpush3.xpose.msk.msra.mxu0 %vm66_vm0, %v41_v10  ;;  %v45_v26 = vld [vmem:[%s773_s1] sm:$0xff]  ;;  %v46_v27 = vld [vmem:[%s773_s1 + $0x8] sm:$0xff]  ;;  %v47_v28 = vld [vmem:[%s773_s1 + $0x10] sm:$0xf] }
  0x12   :  { %489 = vmatprep.subr.mxu0 %v574_v2  ;;  %v207_v44 = vld [vmem:[%s775_s3] sm:$0xff]  ;;  %v208_v45 = vld [vmem:[%s775_s3 + $0x8] sm:$0xff]  ;;  %v209_v46 = vld [vmem:[%s775_s3 + $0x10] sm:$0xf] }
  0x13   :  { %v325_v62 = vld [vmem:[%s777_s5] sm:$0x1]  ;;  %s556_s5 = scalar_lea.vmem %s420_s29, 32 }
  0x14   :  { %329 = vperm.xlu0 %550, %v326_v14   ;;  %p558_p2 = scmp.lt.s32.totalorder %s556_s5, %s552_s30 }
  0x15   :  { %490 = vmatpush3.xpose.msk.msra.mxu0 %vm66_vm0, %v40_v13 }
  0x16   :  { %491 = vmatprep.subr.mxu0 %v574_v2  ;;  %p559_p3 = por %p558_p2, %p557_p1 }
  0x18   :  { %p560_p4 = pnand %p559_p3, %p553_p0 }
  0x19   :  { %492 = vmatpush3.xpose.msk.msra.mxu0 %vm66_vm0, %v39_v15 }
  0x1a   :  { %493 = vmatprep.subr.mxu0 %v574_v2 }
  0x1d   :  { %494 = vmatpush3.xpose.msk.msra.mxu0 %vm66_vm0, %v38_v16 }
  0x1e   :  { %495 = vmatprep.subr.mxu0 %v574_v2 }
  0x21   :  { %496 = vmatpush3.xpose.msk.msra.mxu0 %vm66_vm0, %v37_v17 }
  0x22   :  { %497 = vmatprep.subr.mxu0 %v574_v2 }
  0x25   :  { %498 = vmatpush3.xpose.msk.msra.mxu0 %vm66_vm0, %v36_v18 }
  0x26   :  { %499 = vmatprep.subr.mxu0 %v574_v2 }
  0x29   :  { %500 = vmatpush3.xpose.msk.msra.mxu0 %vm66_vm0, %v35_v19 }
  0x2a   :  { %501 = vmatprep.subr.mxu0 %v574_v2 }
  0x2d   :  { %502 = vmatpush3.xpose.msk.msra.mxu0 %vm66_vm0, %v34_v20 }
  0x2e   :  { %503 = vmatprep.subr.mxu0 %v574_v2 }
  0x31   :  { %504 = vmatpush3.xpose.msk.msra.mxu0 %vm66_vm0, %v33_v21 }
  0x32   :  { %505 = vmatprep.subr.mxu0 %v574_v2 }
  0x35   :  { %506 = vmatpush3.xpose.msk.msra.mxu0 %vm66_vm0, %v32_v22 }
  0x36   :  { %507 = vmatprep.subr.mxu0 %v574_v2 }
  0x39   :  { %508 = vmatpush3.xpose.msk.msra.mxu0 %vm66_vm0, %v31_v23 }
  0x3a   :  { %509 = vmatprep.subr.mxu0 %v574_v2 }
  0x3d   :  { %510 = vmatpush3.xpose.msk.msra.mxu0 %vm66_vm0, %v30_v24 }
  0x3e   :  { %511 = vmatprep.subr.mxu0 %v574_v2 }
  0x41   :  { %512 = vmatpush3.xpose.msk.msra.mxu0 %vm66_vm0, %v29_v25 }
  0x44   :  { %514 = vmatmul.mubr.msk.f32.vlgmr.msra.gmra.mxu0 %vm66_vm0, %v45_v26 }
  0x45   :  { %516 = vmatprep.mubr.msk.f32.mxu0 %vm575_vm1, %v574_v2 }
  0x48   :  { %517 = vmatmul.mubr.msk.f32.gmra.mxu0 %vm66_vm0, %v46_v27 }
  0x49   :  { %519 = vmatprep.mubr.msk.f32.mxu0 %vm575_vm1, %v574_v2 }
  0x4c   :  { %520 = vmatmul.mubr.msk.f32.gmra.mxu0 %vm66_vm0, %v47_v28 }
  0x83   :  { %v64_v30 = vpop.permute.xlu0 %63  ;;  %v54_v34 = vpop.permute.xlu1 %53 }
  0x87   :  { %v59_v35 = vpop.permute.xlu0 %58  ;;  %v226_v49 = vpop.permute.xlu1 %225 }
  0x8b   :  { %v221_v52 = vpop.permute.xlu0 %220  ;;  %v216_v56 = vpop.permute.xlu1 %215 }
  0x8f   :  { %v330_v3 = vpop.permute.xlu0 %329 }
  0x90   :  { %v335_v4 = vrot.slane %v330_v3, %v334_v1 }
 0x104   :  { %v190_v29 = vpop.f32.mrf.mxu0 }
 0x105   :  { %v191_v40 = vadd.f32 %v190_v29, %v54_v34 }
 0x106   :  { %v515_v31 = vpop.f32.mrf.mxu0 }
 0x107   :  { %v204_v43 = vmax.f32 %v191_v40, 0.0 }
 0x108   :  { %v195_v32 = vpop.f32.mrf.mxu0 }
 0x109   :  { %v196_v37 = vadd.f32 %v195_v32, %v59_v35 }
 0x10a   :  { %v518_v33 = vpop.f32.mrf.mxu0 }
 0x10b   :  { %v205_v42 = vmax.f32 %v196_v37, 0.0 }
 0x10c   :  { %v200_v36 = vpop.f32.mrf.mxu0 }
 0x10d   :  { %v201_v38 = vadd.f32 %v200_v36, %v64_v30 }
 0x10e   :  { %v521_v39 = vpop.f32.mrf.mxu0 }
 0x10f   :  { %v206_v41 = vmax.f32 %v201_v38, 0.0 }
 0x111   :  { %523 = vmatpush3.msk.msra.mxu1 %vm238_vm2, %v206_v41 }
 0x112   :  { %524 = vmatprep.subr.mxu1 %v574_v2 }
 0x113   :  { %525 = vmatpush3.msra.mxu1 %v205_v42 }
 0x114   :  { %526 = vmatprep.subr.mxu1 %v574_v2 }
 0x115   :  { %527 = vmatpush3.msra.mxu1 %v204_v43 }
 0x116   :  { %529 = vmatmul.mubr.msk.f32.vlgmr.msra.gmra.mxu1 %vm228_vm3, %v207_v44  ;;  %537 = vmatprep.subr.mxu1 %v574_v2 }
 0x117   :  { %531 = vmatprep.mubr.msk.f32.mxu1 %vm575_vm1, %v574_v2 }
 0x11a   :  { %532 = vmatmul.mubr.msk.f32.gmra.mxu1 %vm228_vm3, %v208_v45 }
 0x11b   :  { %534 = vmatprep.mubr.msk.f32.mxu1 %vm575_vm1, %v574_v2 }
 0x11e   :  { %535 = vmatmul.mubr.msk.f32.gmra.mxu1 %vm228_vm3, %v209_v46 }
 0x11f   :  { %543 = vmatprep.mubr.msk.f32.mxu1 %vm575_vm1, %v574_v2 }
 0x1d6   :  { %v308_v47 = vpop.f32.mrf.mxu1 }
 0x1d7   :  { %v309_v58 = vadd.f32 %v308_v47, %v216_v56 }
 0x1d8   :  { %v530_v48 = vpop.f32.mrf.mxu1 }
 0x1d9   :  { %v322_v61 = vmax.f32 %v309_v58, 0.0 }
 0x1da   :  { %v313_v50 = vpop.f32.mrf.mxu1 }
 0x1db   :  { %v314_v54 = vadd.f32 %v313_v50, %v221_v52 }
 0x1dc   :  { %v533_v51 = vpop.f32.mrf.mxu1 }
 0x1dd   :  { %v323_v60 = vmax.f32 %v314_v54, 0.0 }
 0x1de   :  { %v318_v53 = vpop.f32.mrf.mxu1 }
 0x1df   :  { %v319_v55 = vadd.f32 %v318_v53, %v226_v49 }
 0x1e0   :  { %v536_v57 = vpop.f32.mrf.mxu1 }
 0x1e1   :  { %v324_v59 = vmax.f32 %v319_v55, 0.0 }
 0x1e3   :  { %538 = vmatpush3.msk.msra.mxu1 %vm238_vm2, %v324_v59 }
 0x1e4   :  { %539 = vmatprep.subr.mxu1 %v574_v2 }
 0x1e5   :  { %540 = vmatpush3.msra.mxu1 %v323_v60 }
 0x1e6   :  { %541 = vmatprep.subr.mxu1 %v574_v2 }
 0x1e7   :  { %542 = vmatpush3.msra.mxu1 %v322_v61 }
 0x1e8   :  { %544 = vmatmul.mubr.msk.f32.vlgmr.msra.gmra.mxu1 %vm228_vm3, %v325_v62 }
 0x2a8   :  { %v408_v5 = vpop.f32.mrf.mxu1 }
 0x2a9   :  { %v409_v6 = vadd.f32 %v408_v5, %v335_v4 }
 0x2aa   :  { %v545_v7 = vpop.f32.mrf.mxu1 }
 0x2ab   :  { %412 = vst [vmem:[#allocation3] sm:$0x1] %v409_v6 }
 0x2ac   :  { %563 = shalt.err (!%p560_p4)
}
 0x2ad   :  { %422 = dma.vmem_to_hbm [thread:$0]  %s420_s29, 16, %s779_s7, [#allocation4]  }
 0x2ae   :  { %572 = dma.done.wait [#allocation4], 16  }
 0x2af   :  { %573 = vsyncadd [#allocation4], 4294967280 }
 0x2b0   :  { %426 = vsyncpa [#allocation4], 1 }

</bundles_post_ra>
